<compile_context>
chip_gen: v6e
topology: v6e:2x2x1
jax: 0.10.0
libtpu: 0.0.40
codegen_flags: <defaults>
</compile_context>

<pallas_src>
import functools
import math

import jax
import jax.numpy as jnp
from jax import lax
from jax.experimental import pallas as pl
from jax.experimental.pallas import tpu as pltpu


# ---------------------------------------------------------------------------
# Shared per-row scalar pipeline: out = x * s  (clip -> expmap0 -> project)
# ---------------------------------------------------------------------------
def _row_scale(x, sumsq, *, c, clip_r):
    """Given x (f32) and the broadcast per-segment sum of x*x, return x * s."""
    sqrt_c = float(c) ** 0.5
    inv_sqrt_c = 1.0 / sqrt_c

    # One rsqrt gives both ||x|| and 1/||x||.  Guard rsqrt(0) = inf.
    inv_norm = lax.rsqrt(jnp.maximum(sumsq, 1e-36))     # EUP
    x_norm = sumsq * inv_norm                           # = ||x||   (VPU)

    if clip_r is not None:
        # feature clipping: fac = min(1, clip_r / (||x|| + 1e-5))
        fac = jnp.minimum(1.0, float(clip_r) * pl.reciprocal(x_norm + 1e-5))
        r = fac * x_norm                                 # ||clipped x||
    else:
        fac = None
        r = x_norm

    # scn >= 0, so one minimum replaces the reference's clamp(-15, 15).
    scn = sqrt_c * jnp.maximum(r, 1e-5)
    # project(expmap0(.)) collapses exactly to clamping tanh at (1 - 1e-3):
    #   ||gamma|| > (1-1e-3)/sqrt_c  <=>  tanh(scn) > 1-1e-3  (for r > 1e-5),
    # and the projected scale equals min(t, 1-1e-3) / (sqrt_c * ||x||).
    t = jnp.minimum(jnp.tanh(jnp.minimum(scn, 15.0)), 1.0 - 1e-3)

    # r >  1e-5 : s = fac*t/(sqrt_c*fac*||x||) = t * inv_norm / sqrt_c   (fac cancels)
    # r <= 1e-5 : scn = sqrt_c*1e-5 is a compile-time constant -> no reciprocal
    s_big = t * (inv_norm * inv_sqrt_c)
    s_small = (t if fac is None else fac * t) * (inv_sqrt_c / 1e-5)
    s = jnp.where(r > 1e-5, s_big, s_small)
    return x * s


# ---------------------------------------------------------------------------
# Kernels
# ---------------------------------------------------------------------------
def _to_poincare_kernel_packed(bd_ref, x_ref, o_ref, *, c, clip_r):
    """Lane-packed tile: each physical row holds k independent feature vectors.

    Per-segment sums (broadcast over the segment's lanes) via a 0/1 block-diagonal
    matmul on the otherwise-idle MXU.  y = x*x is split into bf16 hi/lo halves so
    two DEFAULT-precision matmuls reproduce the f32 result (bd is exact in bf16),
    avoiding precision=HIGHEST's operand-splitting VPU overhead.
    """
    x = x_ref[...].astype(jnp.float32)
    y = x * x
    y_hi = y.astype(jnp.bfloat16)
    y_lo = (y - y_hi.astype(jnp.float32)).astype(jnp.bfloat16)
    bd = bd_ref[...]
    sumsq = jnp.dot(y_hi, bd, preferred_element_type=jnp.float32)
    sumsq = sumsq + jnp.dot(y_lo, bd, preferred_element_type=jnp.float32)
    o_ref[...] = _row_scale(x, sumsq, c=c, clip_r=clip_r).astype(o_ref.dtype)


def _to_poincare_kernel_flat(x_ref, o_ref, *, c, clip_r):
    """Fallback tile: feature dim is the full last axis; one XLU reduction per row."""
    x = x_ref[...].astype(jnp.float32)
    sumsq = jnp.sum(x * x, axis=-1, keepdims=True)
    o_ref[...] = _row_scale(x, sumsq, c=c, clip_r=clip_r).astype(o_ref.dtype)


# ---------------------------------------------------------------------------
# Wrapper helpers
# ---------------------------------------------------------------------------
@functools.lru_cache(maxsize=8)
def _block_diag_ones(width, seg):
    """(width, width) bf16 block-diagonal matrix of ones with seg-wide blocks."""
    lane = jnp.arange(width) // seg
    return (lane[:, None] == lane[None, :]).astype(jnp.bfloat16)


def _tpu_hints():
    """(tensorcores_per_chip, physical_vmem_bytes) with conservative fallbacks."""
    cores = 1
    vmem = 64 * 1024 * 1024          # v7x-safe default if detection fails
    try:
        info = pltpu.get_tpu_info()
        vmem = int(getattr(info, "vmem_capacity_bytes", vmem))
    except Exception:
        pass
    try:
        if "v7" in jax.devices()[0].device_kind.lower():
            cores = 2                # v7x has 2 TensorCores per chip
    except Exception:
        pass
    return cores, vmem


def _pick_block_rows(rows, width, itemsize, block_bytes, num_cores):
    """Largest row tile within ~block_bytes per buffer, respecting sublane packing.

    On multi-TC chips (v7x) cap the tile so the ("parallel",) grid has >= 2 steps
    per core (keeps both cores busy with double-buffered DMA).  On single-TC parts
    (v5e/v6e) never split a tile that already fits in one block.
    """
    sub = {1: 32, 2: 16, 4: 8}.get(itemsize, 8)
    per_row = width * max(itemsize, 4)          # f32 intermediates dominate VMEM
    br = max(sub, (block_bytes // per_row) // sub * sub)
    if br >= rows:
        br = rows                               # full-extent block (legal for any rows)
    if num_cores > 1:
        target_steps = 2 * num_cores
        if rows >= target_steps * sub:
            cap = max(sub, (rows // target_steps) // sub * sub)
            br = min(br, cap)
    return br


# ---------------------------------------------------------------------------
# Public entry point
# ---------------------------------------------------------------------------
def to_poincare(x, *, c=1.0, clip_r=2.3, block_bytes=None):
    """Maps points whose LAST axis is the feature dim onto the Poincare ball.

    Matches ToPoincare(c, clip_r).forward(x) from the PyTorch reference.
    """
    orig_shape = x.shape
    d = orig_shape[-1]
    n = x.size // d
    x2 = x.reshape(n, d)

    # Lane packing (lcm-based): fold k = lcm(d,128)/d logical rows into one
    # lane-dense physical row so loads/stores are unmasked full-lane accesses.
    width = (d * 128) // math.gcd(d, 128)        # lcm(d, 128)
    k = width // d
    packed = (k > 1) and (width <= 512) and (n % k == 0)
    if packed:
        rows = n // k
        x2 = x2.reshape(rows, width)
    else:
        rows, width = n, d

    num_cores, vmem_phys = _tpu_hints()
    if vmem_phys >= 100 * 1024 * 1024:           # 128 MiB parts (v5e / v6e)
        vmem_limit = 64 * 1024 * 1024
        auto_block = 4 * 1024 * 1024
    else:                                        # 64 MiB part (v7x) or unknown
        vmem_limit = 40 * 1024 * 1024
        auto_block = 2 * 1024 * 1024
    if block_bytes is None:
        block_bytes = auto_block

    br = _pick_block_rows(rows, width, x.dtype.itemsize, block_bytes, num_cores)
    grid = (pl.cdiv(rows, br),)                  # ragged last block handled by Pallas

    common = dict(
        out_shape=jax.ShapeDtypeStruct((rows, width), x.dtype),
        compiler_params=pltpu.CompilerParams(
            dimension_semantics=("parallel",),
            vmem_limit_bytes=vmem_limit,
        ),
    )
    out_spec = pl.BlockSpec((br, width), lambda i: (i, 0))
    cr = None if clip_r is None else float(clip_r)

    if packed:
        kernel = functools.partial(_to_poincare_kernel_packed, c=float(c), clip_r=cr)
        bd = _block_diag_ones(width, d)
        out = pl.pallas_call(
            kernel,
            grid_spec=pltpu.PrefetchScalarGridSpec(
                num_scalar_prefetch=0,
                grid=grid,
                in_specs=[
                    # bd stays VMEM-resident: constant block index => fetched once.
                    pl.BlockSpec((width, width), lambda i: (0, 0)),
                    pl.BlockSpec((br, width), lambda i: (i, 0)),
                ],
                out_specs=out_spec,
            ),
            **common,
        )(bd, x2)
    else:
        kernel = functools.partial(_to_poincare_kernel_flat, c=float(c), clip_r=cr)
        out = pl.pallas_call(
            kernel,
            grid_spec=pltpu.PrefetchScalarGridSpec(
                num_scalar_prefetch=0,
                grid=grid,
                in_specs=[pl.BlockSpec((br, width), lambda i: (i, 0))],
                out_specs=out_spec,
            ),
            **common,
        )(x2)

    return out.reshape(orig_shape)


# ---------------------------------------------------------------------------
# Pure-JAX reference (mirrors the PyTorch code) for verification
# ---------------------------------------------------------------------------
def _to_poincare_ref(x, *, c=1.0, clip_r=2.3):
    x = x.astype(jnp.float32)
    sqrt_c = c ** 0.5
    if clip_r is not None:
        x_norm = jnp.linalg.norm(x, axis=-1, keepdims=True) + 1e-5
        fac = jnp.minimum(jnp.ones_like(x_norm), clip_r / x_norm)
        x = x * fac
    u_norm = jnp.maximum(jnp.linalg.norm(x, axis=-1, keepdims=True), 1e-5)
    gamma = jnp.tanh(jnp.clip(sqrt_c * u_norm, -15.0, 15.0)) * x / (sqrt_c * u_norm)
    norm = jnp.maximum(jnp.linalg.norm(gamma, axis=-1, keepdims=True), 1e-5)
    maxnorm = (1.0 - 1e-3) / sqrt_c
    projected = gamma / norm * maxnorm
    return jnp.where(norm > maxnorm, projected, gamma)


if __name__ == "__main__":
    # ToPoincare has no learned parameters (xp is registered as None);
    # hyperparameters c and clip_r are fixed here.
    C = 1.0
    CLIP_R = 2.3

    key = jax.random.PRNGKey(0)
    k1, k2, k3, k4 = jax.random.split(key, 4)

    # 1) packed path (128 % 32 == 0): batch=2, seq=8, hidden=32.
    x1 = jax.random.normal(k1, (2, 8, 32), dtype=jnp.float32) * 3.0
    o1 = jax.block_until_ready(to_poincare(x1, c=C, clip_r=CLIP_R))
    r1 = _to_poincare_ref(x1, c=C, clip_r=CLIP_R)
    assert o1.shape == x1.shape and o1.dtype == x1.dtype
    assert jnp.allclose(o1.astype(jnp.float32), r1, atol=1e-5, rtol=1e-5), "mismatch (packed)"

    # 2) packed path with a multi-step grid and a ragged last block
    #    (20 packed rows, 8-row tiles via an explicit tiny block_bytes).
    x2 = jax.random.normal(k2, (5, 16, 32), dtype=jnp.float32) * 3.0
    o2 = jax.block_until_ready(to_poincare(x2, c=C, clip_r=CLIP_R, block_bytes=4096))
    r2 = _to_poincare_ref(x2, c=C, clip_r=CLIP_R)
    assert jnp.allclose(o2.astype(jnp.float32), r2, atol=1e-5, rtol=1e-5), "mismatch (ragged)"

    # 3) lcm-packed path (d=96 -> width=384, 4 rows/physical row) with clip_r=None
    #    so the ball-projection (tanh clamp) branch is exercised.
    x3 = jax.random.normal(k3, (2, 8, 96), dtype=jnp.float32) * 3.0
    o3 = jax.block_until_ready(to_poincare(x3, c=C, clip_r=None))
    r3 = _to_poincare_ref(x3, c=C, clip_r=None)
    assert jnp.allclose(o3.astype(jnp.float32), r3, atol=1e-5, rtol=1e-5), "mismatch (lcm packed)"

    # 4) flat fallback path: d=96 but n=15 is not divisible by k=4.
    x4 = jax.random.normal(k4, (3, 5, 96), dtype=jnp.float32) * 3.0
    o4 = jax.block_until_ready(to_poincare(x4, c=C, clip_r=CLIP_R))
    r4 = _to_poincare_ref(x4, c=C, clip_r=CLIP_R)
    assert jnp.allclose(o4.astype(jnp.float32), r4, atol=1e-5, rtol=1e-5), "mismatch (fallback)"

    print("KERNEL_OK")
</pallas_src>

<mosaic_0001>
module attributes {stable_mosaic.version = 11 : i64} {
  func.func @_to_poincare_kernel_packed(%arg0: i32, %arg1: memref<128x128xbf16, #tpu.memory_space<vmem>>, %arg2: memref<4x128xf32, #tpu.memory_space<vmem>>, %arg3: memref<4x128xf32, #tpu.memory_space<vmem>>) attributes {dimension_semantics = [#tpu.dimension_semantics<parallel>], iteration_bounds = array<i64: 1>, scalar_prefetch = 0 : i64, scratch_operands = 0 : i64, tpu.core_type = #tpu.core_type<tc>, window_params = [{pipeline_mode = #tpu.pipeline_mode<synchronous>, transform_indices = @transform_0, window_bounds = array<i64: 128, 128>}, {transform_indices = @transform_1, window_bounds = array<i64: 4, 128>}, {transform_indices = @transform_2, window_bounds = array<i64: 4, 128>}]} {
    %c0 = arith.constant 0 : index
    %c0_0 = arith.constant 0 : index
    %0 = vector.load %arg2[%c0, %c0_0] : memref<4x128xf32, #tpu.memory_space<vmem>>, vector<4x128xf32>
    %1 = arith.mulf %0, %0 : vector<4x128xf32>
    %2 = arith.truncf %1 : vector<4x128xf32> to vector<4x128xbf16>
    %3 = arith.extf %2 : vector<4x128xbf16> to vector<4x128xf32>
    %4 = arith.subf %1, %3 : vector<4x128xf32>
    %5 = arith.truncf %4 : vector<4x128xf32> to vector<4x128xbf16>
    %c0_1 = arith.constant 0 : index
    %c0_2 = arith.constant 0 : index
    %6 = vector.load %arg1[%c0_1, %c0_2] : memref<128x128xbf16, #tpu.memory_space<vmem>>, vector<128x128xbf16>
    %cst = arith.constant dense<0.000000e+00> : vector<4x128xf32>
    %7 = tpu.matmul %2, %6, %cst {dimension_numbers = #tpu.dot_dimension_numbers<[1], [0], [0], [1], [0, 0, 1, 1], [], []>} : vector<4x128xbf16>, vector<128x128xbf16>, vector<4x128xf32> -> vector<4x128xf32>
    %cst_3 = arith.constant dense<0.000000e+00> : vector<4x128xf32>
    %8 = tpu.matmul %5, %6, %cst_3 {dimension_numbers = #tpu.dot_dimension_numbers<[1], [0], [0], [1], [0, 0, 1, 1], [], []>} : vector<4x128xbf16>, vector<128x128xbf16>, vector<4x128xf32> -> vector<4x128xf32>
    %9 = arith.addf %7, %8 : vector<4x128xf32>
    %cst_4 = arith.constant 1.000000e-36 : f32
    %10 = vector.broadcast %cst_4 : f32 to vector<4x128xf32>
    %11 = arith.maximumf %9, %10 : vector<4x128xf32>
    %12 = math.rsqrt %11 : vector<4x128xf32>
    %13 = arith.mulf %9, %12 : vector<4x128xf32>
    %cst_5 = arith.constant 9.99999974E-6 : f32
    %14 = vector.broadcast %cst_5 : f32 to vector<4x128xf32>
    %15 = arith.addf %13, %14 : vector<4x128xf32>
    %16 = tpu.reciprocal %15 : vector<4x128xf32> -> vector<4x128xf32>
    %cst_6 = arith.constant 2.300000e+00 : f32
    %17 = vector.broadcast %cst_6 : f32 to vector<4x128xf32>
    %18 = arith.mulf %17, %16 : vector<4x128xf32>
    %cst_7 = arith.constant 1.000000e+00 : f32
    %19 = vector.broadcast %cst_7 : f32 to vector<4x128xf32>
    %20 = arith.minimumf %19, %18 : vector<4x128xf32>
    %21 = arith.mulf %20, %13 : vector<4x128xf32>
    %cst_8 = arith.constant 9.99999974E-6 : f32
    %22 = vector.broadcast %cst_8 : f32 to vector<4x128xf32>
    %23 = arith.maximumf %21, %22 : vector<4x128xf32>
    %cst_9 = arith.constant 1.000000e+00 : f32
    %24 = vector.broadcast %cst_9 : f32 to vector<4x128xf32>
    %25 = arith.mulf %24, %23 : vector<4x128xf32>
    %cst_10 = arith.constant 1.500000e+01 : f32
    %26 = vector.broadcast %cst_10 : f32 to vector<4x128xf32>
    %27 = arith.minimumf %25, %26 : vector<4x128xf32>
    %28 = math.tanh %27 : vector<4x128xf32>
    %cst_11 = arith.constant 9.990000e-01 : f32
    %29 = vector.broadcast %cst_11 : f32 to vector<4x128xf32>
    %30 = arith.minimumf %28, %29 : vector<4x128xf32>
    %cst_12 = arith.constant 1.000000e+00 : f32
    %31 = vector.broadcast %cst_12 : f32 to vector<4x128xf32>
    %32 = arith.mulf %12, %31 : vector<4x128xf32>
    %33 = arith.mulf %30, %32 : vector<4x128xf32>
    %34 = arith.mulf %20, %30 : vector<4x128xf32>
    %cst_13 = arith.constant 1.000000e+05 : f32
    %35 = vector.broadcast %cst_13 : f32 to vector<4x128xf32>
    %36 = arith.mulf %34, %35 : vector<4x128xf32>
    %cst_14 = arith.constant 9.99999974E-6 : f32
    %37 = vector.broadcast %cst_14 : f32 to vector<4x128xf32>
    %38 = arith.cmpf ogt, %21, %37 : vector<4x128xf32>
    %39 = arith.select %38, %33, %36 : vector<4x128xi1>, vector<4x128xf32>
    %40 = arith.mulf %0, %39 : vector<4x128xf32>
    %c0_15 = arith.constant 0 : index
    %c0_16 = arith.constant 0 : index
    %41 = vector.load %arg3[%c0_15, %c0_16] : memref<4x128xf32, #tpu.memory_space<vmem>>, vector<4x128xf32>
    tpu.vector_store %arg3[%c0_15, %c0_16], %40 {strides = array<i32>} : memref<4x128xf32, #tpu.memory_space<vmem>>, vector<4x128xf32>,
    return
  }
  func.func @transform_0(%arg0: i32) -> (i32, i32) {
    %c0_i32 = arith.constant 0 : i32
    %c0_i32_0 = arith.constant 0 : i32
    %c0_i32_1 = arith.constant 0 : i32
    return %c0_i32, %c0_i32_0 : i32, i32
  }
  func.func @transform_1(%arg0: i32) -> (i32, i32) {
    %c0_i32 = arith.constant 0 : i32
    %c0_i32_0 = arith.constant 0 : i32
    return %arg0, %c0_i32 : i32, i32
  }
  func.func @transform_2(%arg0: i32) -> (i32, i32) {
    %c0_i32 = arith.constant 0 : i32
    %c0_i32_0 = arith.constant 0 : i32
    return %arg0, %c0_i32 : i32, i32
  }
}

</mosaic_0001>

<bundles_post_ra>
// kernel: tpu_custom_call.1
= control target key start
LH: loop header
LB: loop body
LE: loop exit
PB: predicated region body
PF: predicated region fallthrough
CT: control target
= control target key end

     0   :  { %7 = vsyncpa [#allocation3], 0  ;;  %s413_s0 = inlined_call_operand.hbm [shape: bf16[128,128], index: 0, kind: input, shape index: {}]   ;;  %s414_s1 = inlined_call_operand.hbm [shape: f32[4,128], index: 1, kind: input, shape index: {}]   ;;  %s415_s2 = inlined_call_operand.hbm [shape: f32[4,128], index: 2, kind: output, shape index: {}]  }
   0x1   :  { %8 = vsyncpa [#allocation6], 0 }
   0x2   :  { %9 = vsyncpa [#allocation4], 0  ;;  %s377_s9 = smov [#allocation2]  }
   0x3   :  { %s15_s10 = sshll.u32 %s377_s9, 4  ;;  %s16_s10 = int_to_ptr.vmem [resolvable:$true] %s15_s10 }
   0x4   :  { %s319_s11 = scalar_lea.vmem %s16_s10, 1024  ;;  %p324_p1 = scmp.lt.s32.totalorder %s16_s10, %s16_s10 }
   0x5   :  { %p320_p0 = scmp.ne.s32.totalorder %s16_s10, %s319_s11  ;;  %p325_p2 = scmp.lt.s32.totalorder %s319_s11, %s319_s11 }
   0x7   :  { %p326_p3 = por %p325_p2, %p324_p1 }
   0x9   :  { %p327_p4 = pnand %p326_p3, %p320_p0 }
   0xb   :  { %330 = shalt.err (!%p327_p4)
}
   0xc   :  { %s378_s12 = smov 64   ;;  %s379_s13 = smov 4  }
   0xd   :  { %21 = dma.hbm_to_vmem [thread:$0]  %s413_s0, 1024, %s16_s10, [#allocation3], %s378_s12, %s378_s12, %s379_s13  }
   0xe   :  { %s380_s16 = smov [#allocation5]  }
   0xf   :  { %s28_s17 = sshll.u32 %s380_s16, 4  ;;  %s29_s17 = int_to_ptr.vmem [resolvable:$true] %s28_s17 }
  0x10   :  { %s339_s18 = scalar_lea.vmem %s29_s17, 64  ;;  %p344_p6 = scmp.lt.s32.totalorder %s29_s17, %s29_s17 }
  0x11   :  { %p340_p5 = scmp.ne.s32.totalorder %s29_s17, %s339_s18  ;;  %p345_p7 = scmp.lt.s32.totalorder %s339_s18, %s339_s18 }
  0x13   :  { %p346_p8 = por %p345_p7, %p344_p6 }
  0x15   :  { %p347_p9 = pnand %p346_p8, %p340_p5 }
  0x17   :  { %350 = shalt.err (!%p347_p9)
}
  0x18   :  { %31 = dma.hbm_to_vmem [thread:$0]  %s414_s1, 64, %s29_s17, [#allocation6]  }
  0x19   :  { %371 = dma.done.wait [#allocation3], 1024  }
  0x1a   :  { %372 = vsyncadd [#allocation3], 4294966272 }
  0x1b   :  { %373 = dma.done.wait [#allocation6], 64  }
  0x1c   :  { %374 = vsyncadd [#allocation6], 4294967232  ;;  %v381_v0 = vmov 0.0   ;;  %vm382_vm0 = vmmov 0   ;;  %v297_v1 = vld [vmem:[#allocation2 + $0x38] sm:$0xff]   ;;  %v298_v2 = vld [vmem:[#allocation2 + $0x30] sm:$0xff]  }
  0x1d   :  { %250 = vmatprep.subr.bf16.mxu0 %v381_v0  ;;  %270 = vmatprep.subr.bf16.mxu1 %v381_v0  ;;  %v299_v3 = vld [vmem:[#allocation2 + $0x28] sm:$0xff]   ;;  %v300_v4 = vld [vmem:[#allocation2 + $0x20] sm:$0xff]   ;;  %v301_v7 = vld [vmem:[#allocation2 + $0x18] sm:$0xff]   ;;  %s383_s0 = smov [#allocation7]  }
  0x1e   :  { %266 = vmatprep.mubr.msk.bf16.mxu0 %vm382_vm0, %v381_v0  ;;  %286 = vmatprep.mubr.msk.bf16.mxu1 %vm382_vm0, %v381_v0  ;;  %v405_v5 = vld [vmem:[#allocation5] sm:$0xf]  ;;  %v302_v9 = vld [vmem:[#allocation2 + $0x10] sm:$0xff]   ;;  %v303_v11 = vld [vmem:[#allocation2 + $0x8] sm:$0xff]   ;;  %s214_s1 = sshll.u32 %s383_s0, 4  ;;  %s215_s1 = int_to_ptr.vmem [resolvable:$true] %s214_s1 }
  0x1f   :  { %251 = vmatpush3.bf16.msra.mxu0 %v297_v1  ;;  %271 = vmatpush3.bf16.msra.mxu1 %v297_v1  ;;  %v40_v6 = vmul.f32 %v405_v5, %v405_v5  ;;  %v304_v13 = vld [vmem:[#allocation2] sm:$0xff]   ;;  %s351_s21 = scalar_lea.vmem %s215_s1, 64  ;;  %p356_p11 = scmp.lt.s32.totalorder %s215_s1, %s215_s1 }
  0x20   :  { %252 = vmatprep.subr.bf16.mxu0 %v381_v0  ;;  %272 = vmatprep.subr.bf16.mxu1 %v381_v0  ;;  %p352_p10 = scmp.ne.s32.totalorder %s215_s1, %s351_s21  ;;  %p357_p12 = scmp.lt.s32.totalorder %s351_s21, %s351_s21 }
  0x21   :  { %v41_v8 = vpack.c.bf16 %v40_v6, %v40_v6 }
  0x22   :  { %p358_p13 = por %p357_p12, %p356_p11 }
  0x23   :  { %253 = vmatpush3.bf16.msra.mxu0 %v298_v2  ;;  %273 = vmatpush3.bf16.msra.mxu1 %v298_v2  ;;  %v42_v10 = vunpack.c.l.bf16 %v41_v8 }
  0x24   :  { %254 = vmatprep.subr.bf16.mxu0 %v381_v0  ;;  %274 = vmatprep.subr.bf16.mxu1 %v381_v0  ;;  %p359_p0 = pnand %p358_p13, %p352_p10 }
  0x25   :  { %v43_v12 = vsub.f32 %v40_v6, %v42_v10 }
  0x27   :  { %255 = vmatpush3.bf16.msra.mxu0 %v299_v3  ;;  %275 = vmatpush3.bf16.msra.mxu1 %v299_v3  ;;  %v44_v14 = vpack.c.bf16 %v43_v12, %v43_v12 }
  0x28   :  { %256 = vmatprep.subr.bf16.mxu0 %v381_v0  ;;  %276 = vmatprep.subr.bf16.mxu1 %v381_v0 }
  0x2b   :  { %257 = vmatpush3.bf16.msra.mxu0 %v300_v4  ;;  %277 = vmatpush3.bf16.msra.mxu1 %v300_v4 }
  0x2c   :  { %258 = vmatprep.subr.bf16.mxu0 %v381_v0  ;;  %278 = vmatprep.subr.bf16.mxu1 %v381_v0 }
  0x2f   :  { %259 = vmatpush3.bf16.msra.mxu0 %v301_v7  ;;  %279 = vmatpush3.bf16.msra.mxu1 %v301_v7 }
  0x30   :  { %260 = vmatprep.subr.bf16.mxu0 %v381_v0  ;;  %280 = vmatprep.subr.bf16.mxu1 %v381_v0 }
  0x33   :  { %261 = vmatpush3.bf16.msra.mxu0 %v302_v9  ;;  %281 = vmatpush3.bf16.msra.mxu1 %v302_v9 }
  0x34   :  { %262 = vmatprep.subr.bf16.mxu0 %v381_v0  ;;  %282 = vmatprep.subr.bf16.mxu1 %v381_v0 }
  0x37   :  { %263 = vmatpush3.bf16.msra.mxu0 %v303_v11  ;;  %283 = vmatpush3.bf16.msra.mxu1 %v303_v11 }
  0x38   :  { %264 = vmatprep.subr.bf16.mxu0 %v381_v0  ;;  %284 = vmatprep.subr.bf16.mxu1 %v381_v0 }
  0x3b   :  { %265 = vmatpush3.bf16.msra.mxu0 %v304_v13  ;;  %285 = vmatpush3.bf16.msra.mxu1 %v304_v13 }
  0x3e   :  { %267 = vmatmul.mubr.bf16.vlgmr.msra.gmra.mxu0 %v44_v14  ;;  %287 = vmatmul.mubr.bf16.vlgmr.msra.gmra.mxu1 %v41_v8 }
  0xfe   :  { %v143_v15 = vpop.f32.mrf.mxu0  ;;  %v183_v16 = vpop.f32.mrf.mxu1 }
  0xff   :  { %v184_v17 = vadd.f32 %v183_v16, %v143_v15 }
 0x100   :  { %v268_v18 = vpop.f32.mrf.mxu0  ;;  %v288_v19 = vpop.f32.mrf.mxu1 }
 0x101   :  { %v189_v20 = vmax.f32 %v184_v17, 1e-36 }
 0x102   :  { %v146_v21 = vpop.f32.mrf.mxu0  ;;  %v186_v22 = vpop.f32.mrf.mxu1 }
 0x103   :  { %305 = vrsqrt.f32 %v189_v20 }
 0x104   :  { %v269_v23 = vpop.f32.mrf.mxu0  ;;  %v289_v24 = vpop.f32.mrf.mxu1 }
 0x110   :  { %v306_v25 = vpop.eup %305 }
 0x111   :  { %v191_v26 = vmul.f32 %v306_v25, %v184_v17 }
 0x113   :  { %v192_v27 = vadd.f32 1e-05, %v191_v26 }
 0x115   :  { %307 = vrcp.f32 %v192_v27 }
 0x122   :  { %v308_v28 = vpop.eup %307 }
 0x123   :  { %v194_v29 = vmul.f32 2.3, %v308_v28 }
 0x125   :  { %v195_v30 = vmin.f32 %v194_v29, 1.0 }
 0x127   :  { %v196_v31 = vmul.f32 %v195_v30, %v191_v26 }
 0x129   :  { %v197_v32 = vmax.f32 %v196_v31, 1e-05  ;;  %vm204_vm1 = vcmp.gt.f32.partialorder %v196_v31, 1e-05 }
 0x12b   :  { %v198_v33 = vmin.f32 %v197_v32, 15.0 }
 0x12d   :  { %309 = vtanh.f32 %v198_v33 }
 0x13a   :  { %v310_v34 = vpop.eup %309 }
 0x13b   :  { %v200_v35 = vmin.f32 %v310_v34, 0.999 }
 0x13d   :  { %v202_v36 = vmul.f32 %v200_v35, %v195_v30  ;;  %v201_v38 = vmul.f32 %v306_v25, %v200_v35 }
 0x13f   :  { %v203_v37 = vmul.f32 100000.0, %v202_v36 }
 0x141   :  { %v205_v39 = vsel %vm204_vm1, %v201_v38, %v203_v37 }
 0x142   :  { %v206_v40 = vmul.f32 %v205_v39, %v405_v5 }
 0x144   :  { %207 = vst [vmem:[#allocation7] sm:$0xf] %v206_v40 }
 0x145   :  { %362 = shalt.err (!%p359_p0)
}
 0x146   :  { %217 = dma.vmem_to_hbm [thread:$0]  %s215_s1, 64, %s415_s2, [#allocation4]  }
 0x147   :  { %375 = dma.done.wait [#allocation4], 64  }
 0x148   :  { %376 = vsyncadd [#allocation4], 4294967232 }
 0x149   :  { %221 = vsyncpa [#allocation3], 1 }
 0x14a   :  { %222 = vsyncpa [#allocation6], 1 }
 0x14b   :  { %223 = vsyncpa [#allocation4], 1 }

</bundles_post_ra>
